<compile_context>
chip_gen: v7x
topology: tpu7x:2x2x1
jax: 0.10.0
libtpu: 0.0.40
codegen_flags: <defaults>
</compile_context>

<pallas_src>
import functools

import jax
import jax.numpy as jnp
from jax.experimental import pallas as pl
from jax.experimental.pallas import tpu as pltpu


def _round_up(x, m):
    return (x + m - 1) // m * m


def _vmem_capacity_bytes():
    """Physical VMEM per TensorCore (conservative 64 MiB fallback = v7x)."""
    try:
        info = pltpu.get_tpu_info()
        cap = getattr(info, "vmem_capacity_bytes", None)
        if cap:
            return int(cap)
    except Exception:
        pass
    return 64 * 1024 * 1024


def _clamp_vmem_limit(need_bytes):
    """Request what we need, but never more than the device can physically give."""
    cap = _vmem_capacity_bytes()
    return int(min(max(int(need_bytes), 32 * 1024 * 1024), cap - (4 << 20)))


# --------------------------------------------------------------------------
# Pass 1: per-head ResBlock stack.  Grid = (num_heads,)
# --------------------------------------------------------------------------
def _resblock_kernel(x_ref, bw_ref, out_ref, *, num_layers):
    """x_ref   : (S, H) f32              shared hidden states
       bw_ref  : (1, num_layers, H, H)   per-head ResBlock weights, bf16, pre-transposed
       out_ref : (1, S, H) bf16          post-ResBlock activations for this head"""
    x = x_ref[...]                                           # f32 residual stream
    for l in range(num_layers):                              # tiny (typically 1) -> static unroll
        y = jnp.dot(x.astype(jnp.bfloat16), bw_ref[0, l],
                    preferred_element_type=jnp.float32)      # MXU, f32 accumulate
        x = x + y * jax.nn.sigmoid(y)                        # SiLU (EUP) + residual (VPU)
    out_ref[0] = x.astype(out_ref.dtype)


# --------------------------------------------------------------------------
# Pass 2: vocab-tiled lm_head.  Grid = (num_heads, num_vocab_tiles)
# --------------------------------------------------------------------------
def _lm_head_kernel_bf16(x_ref, lw_ref, out_ref):
    """x_ref  : (1, S, H)     bf16 per-head activations
       lw_ref : (1, 1, H, tv) bf16 pre-tiled weight slab (contiguous in HBM)
       out_ref: (1, S, tv)    bf16 logits tile"""
    logits = jnp.dot(x_ref[0], lw_ref[0, 0], preferred_element_type=jnp.float32)
    out_ref[0] = logits.astype(out_ref.dtype)


def _lm_head_kernel_int8(x_ref, lw_ref, scale_ref, out_ref):
    """int8 weight path: dequantize by scaling the f32 logits after the dot.
       lw_ref   : (1, 1, H, tv) int8
       scale_ref: (1, 1, 1, tv) f32 per-vocab-column scales"""
    w = lw_ref[0, 0].astype(jnp.bfloat16)        # |q| <= 127 -> exact in bf16
    logits = jnp.dot(x_ref[0], w, preferred_element_type=jnp.float32)
    out_ref[0] = (logits * scale_ref[0, 0]).astype(out_ref.dtype)


# --------------------------------------------------------------------------
# Wrapper
# --------------------------------------------------------------------------
def medusa_forward(hidden_states, block_weights, lm_head_weights, *,
                   tv=None, lm_head_dtype="bf16"):
    """hidden_states  : [S, H] f32
       block_weights  : [num_heads, num_layers, H, H]  (torch Linear.weight.T)
       lm_head_weights: [num_heads, H, V]              (torch Linear.weight.T)
       lm_head_dtype  : "bf16" (exact semantics) or "int8" (per-column quantized)
       returns        : stacked logits [num_heads, S, V] in bf16
                        (index along axis 0 to recover the per-head list)."""
    S, H = hidden_states.shape
    num_heads, num_layers = block_weights.shape[0], block_weights.shape[1]
    V = lm_head_weights.shape[-1]

    # Pad S so bf16 activation/output blocks are fully packed sublane tiles.
    s_pad = _round_up(max(S, 1), 16)
    if s_pad != S:
        hidden_states = jnp.pad(hidden_states, ((0, s_pad - S), (0, 0)))
    hidden_states = hidden_states.astype(jnp.float32)
    block_weights = block_weights.astype(jnp.bfloat16)

    # -------------------- Pass 1: ResBlock --------------------
    # TODO(synk): at H=4096 / L=1 on v7x the double-buffered per-head ResBlock
    #             weights are 64 MiB; use pipeline_mode=pl.Buffered(1) or tile the
    #             output columns there.  Irrelevant at demo sizes.
    resblock_vmem = (2 * s_pad * H * 4
                     + 2 * num_layers * H * H * 2
                     + 2 * s_pad * H * 2
                     + (2 << 20))
    acts = pl.pallas_call(
        functools.partial(_resblock_kernel, num_layers=num_layers),
        out_shape=jax.ShapeDtypeStruct((num_heads, s_pad, H), jnp.bfloat16),
        grid_spec=pltpu.PrefetchScalarGridSpec(
            num_scalar_prefetch=0,
            grid=(num_heads,),
            in_specs=[
                pl.BlockSpec((s_pad, H), lambda h: (0, 0)),
                pl.BlockSpec((1, num_layers, H, H), lambda h: (h, 0, 0, 0)),
            ],
            out_specs=pl.BlockSpec((1, s_pad, H), lambda h: (h, 0, 0)),
        ),
        compiler_params=pltpu.CompilerParams(
            dimension_semantics=("parallel",),
            vmem_limit_bytes=_clamp_vmem_limit(resblock_vmem),
        ),
        cost_estimate=pl.CostEstimate(
            flops=2 * num_heads * num_layers * s_pad * H * H,
            transcendentals=num_heads * num_layers * s_pad * H,
            bytes_accessed=(s_pad * H * 4
                            + num_heads * num_layers * H * H * 2
                            + num_heads * s_pad * H * 2),
        ),
    )(hidden_states, block_weights)

    # -------------------- Pass 2: lm_head --------------------
    if tv is None:
        # 4096 on 128 MiB parts (v5e/v6e), 2048 on 64 MiB parts (v7x).
        tv = 4096 if _vmem_capacity_bytes() > (96 << 20) else 2048
    tv = min(_round_up(tv, 128), _round_up(V, 128))
    v_pad = _round_up(V, tv)
    nvt = v_pad // tv

    lw = lm_head_weights.astype(jnp.float32)
    if v_pad != V:
        lw = jnp.pad(lw, ((0, 0), (0, 0), (0, v_pad - V)))

    if lm_head_dtype == "int8":
        # Per-vocab-column symmetric int8 quantization (one-time weight prep).
        amax = jnp.max(jnp.abs(lw), axis=1, keepdims=True)          # [heads, 1, v_pad]
        scale = jnp.maximum(amax, 1e-8) / 127.0
        lw_q = jnp.clip(jnp.round(lw / scale), -127, 127).astype(jnp.int8)
        # Pre-tile so each per-step DMA is one contiguous slab.
        lw_tiled = lw_q.reshape(num_heads, H, nvt, tv).transpose(0, 2, 1, 3)
        scale_tiled = scale.reshape(num_heads, 1, nvt, tv).transpose(0, 2, 1, 3)
        w_bytes = 1
    else:
        # TODO(synk): fp8(e4m3) weights for v7x (no int MXU path there).
        lw_tiled = lw.astype(jnp.bfloat16).reshape(
            num_heads, H, nvt, tv).transpose(0, 2, 1, 3)
        scale_tiled = None
        w_bytes = 2

    lmhead_vmem = (2 * s_pad * H * 2                     # per-head activations (bf16)
                   + 2 * H * tv * w_bytes                # weight tile
                   + 2 * s_pad * tv * 2                  # output tile (bf16)
                   + (2 * tv * 4 if scale_tiled is not None else 0)
                   + (2 << 20))                          # headroom

    cost = pl.CostEstimate(
        flops=2 * num_heads * s_pad * H * v_pad,
        transcendentals=0,
        bytes_accessed=(num_heads * s_pad * H * 2
                        + num_heads * H * v_pad * w_bytes
                        + num_heads * s_pad * v_pad * 2),
    )

    x_spec = pl.BlockSpec((1, s_pad, H), lambda h, j: (h, 0, 0))
    w_spec = pl.BlockSpec((1, 1, H, tv), lambda h, j: (h, j, 0, 0))
    out_spec = pl.BlockSpec((1, s_pad, tv), lambda h, j: (h, 0, j))
    compiler_params = pltpu.CompilerParams(
        dimension_semantics=("parallel", "parallel"),    # load-balances both TCs on v7x
        vmem_limit_bytes=_clamp_vmem_limit(lmhead_vmem),
    )

    if lm_head_dtype == "int8":
        s_spec = pl.BlockSpec((1, 1, 1, tv), lambda h, j: (h, j, 0, 0))
        out = pl.pallas_call(
            _lm_head_kernel_int8,
            out_shape=jax.ShapeDtypeStruct((num_heads, s_pad, v_pad), jnp.bfloat16),
            grid_spec=pltpu.PrefetchScalarGridSpec(
                num_scalar_prefetch=0,
                grid=(num_heads, nvt),
                in_specs=[x_spec, w_spec, s_spec],
                out_specs=out_spec,
            ),
            compiler_params=compiler_params,
            cost_estimate=cost,
        )(acts, lw_tiled, scale_tiled)
    else:
        out = pl.pallas_call(
            _lm_head_kernel_bf16,
            out_shape=jax.ShapeDtypeStruct((num_heads, s_pad, v_pad), jnp.bfloat16),
            grid_spec=pltpu.PrefetchScalarGridSpec(
                num_scalar_prefetch=0,
                grid=(num_heads, nvt),
                in_specs=[x_spec, w_spec],
                out_specs=out_spec,
            ),
            compiler_params=compiler_params,
            cost_estimate=cost,
        )(acts, lw_tiled)

    return out[:, :S, :V]


# --------------------------------------------------------------------------
# Pure-JAX reference mirroring the kernel's dtype handling
# --------------------------------------------------------------------------
def _ref_forward(hidden_states, block_weights, lm_head_weights, *, lm_head_dtype="bf16"):
    num_heads, num_layers = block_weights.shape[0], block_weights.shape[1]
    bw = block_weights.astype(jnp.bfloat16).astype(jnp.float32)
    if lm_head_dtype == "int8":
        amax = jnp.max(jnp.abs(lm_head_weights), axis=1, keepdims=True)
        scale = jnp.maximum(amax, 1e-8) / 127.0
        q = jnp.clip(jnp.round(lm_head_weights / scale), -127, 127)
        lw = q * scale
    else:
        lw = lm_head_weights.astype(jnp.bfloat16).astype(jnp.float32)
    outs = []
    for h in range(num_heads):
        x = hidden_states.astype(jnp.float32)
        for l in range(num_layers):
            xb = x.astype(jnp.bfloat16).astype(jnp.float32)
            y = xb @ bw[h, l]
            x = x + y * jax.nn.sigmoid(y)
        xb = x.astype(jnp.bfloat16).astype(jnp.float32)
        outs.append(xb @ lw[h])
    return outs


if __name__ == "__main__":
    # Small TPU-friendly shapes consistent with MedusaConfig semantics.
    S = 8            # sequence / token batch
    H = 128          # hidden_size
    V = 2000         # vocab_size (non-multiple of the tile -> exercises padding)
    NUM_HEADS = 3    # config.num_heads
    NUM_LAYERS = 2   # config.num_hidden_layers
    TV = 512         # vocab tile -> 4 tiles, exercises the streaming grid

    key = jax.random.PRNGKey(0)
    k_x, k_bw, k_lw = jax.random.split(key, 3)

    hidden_states = jax.random.normal(k_x, (S, H), dtype=jnp.float32)
    block_weights = jax.random.uniform(
        k_bw, (NUM_HEADS, NUM_LAYERS, H, H), dtype=jnp.float32,
        minval=-1.0, maxval=1.0) / jnp.sqrt(H)
    lm_head_weights = jax.random.uniform(
        k_lw, (NUM_HEADS, H, V), dtype=jnp.float32,
        minval=-1.0, maxval=1.0) / jnp.sqrt(H)

    for dt in ("bf16", "int8"):
        logits = medusa_forward(hidden_states, block_weights, lm_head_weights,
                                tv=TV, lm_head_dtype=dt)
        logits = jax.block_until_ready(logits)
        assert logits.shape == (NUM_HEADS, S, V)

        ref = _ref_forward(hidden_states, block_weights, lm_head_weights,
                           lm_head_dtype=dt)
        for h in range(NUM_HEADS):
            got = logits[h].astype(jnp.float32)
            want = ref[h]
            assert got.shape == (S, V)
            assert jnp.allclose(got, want, atol=2e-2, rtol=2e-2), \
                f"{dt} head {h}: mismatch vs reference"

    print("KERNEL_OK")
</pallas_src>

<mosaic_0001>
module attributes {stable_mosaic.version = 11 : i64} {
  func.func @_resblock_kernel(%arg0: i32, %arg1: memref<16x128xf32, #tpu.memory_space<vmem>>, %arg2: memref<1x2x128x128xbf16, #tpu.memory_space<vmem>>, %arg3: memref<1x16x128xbf16, #tpu.memory_space<vmem>>) attributes {dimension_semantics = [#tpu.dimension_semantics<parallel>], iteration_bounds = array<i64: 3>, scalar_prefetch = 0 : i64, scratch_operands = 0 : i64, tpu.core_type = #tpu.core_type<tc>, window_params = [{pipeline_mode = #tpu.pipeline_mode<synchronous>, transform_indices = @transform_0, window_bounds = array<i64: 16, 128>}, {transform_indices = @transform_1, window_bounds = array<i64: 1, 2, 128, 128>}, {transform_indices = @transform_2, window_bounds = array<i64: 1, 16, 128>}]} {
    %c0 = arith.constant 0 : index
    %c0_0 = arith.constant 0 : index
    %0 = vector.load %arg1[%c0, %c0_0] : memref<16x128xf32, #tpu.memory_space<vmem>>, vector<16x128xf32>
    %1 = arith.truncf %0 : vector<16x128xf32> to vector<16x128xbf16>
    %c0_1 = arith.constant 0 : index
    %c0_2 = arith.constant 0 : index
    %c0_3 = arith.constant 0 : index
    %c0_4 = arith.constant 0 : index
    %2 = vector.load %arg2[%c0_1, %c0_2, %c0_3, %c0_4] : memref<1x2x128x128xbf16, #tpu.memory_space<vmem>>, vector<1x1x128x128xbf16>
    %3 = vector.shape_cast %2 : vector<1x1x128x128xbf16> to vector<128x128xbf16>
    %cst = arith.constant dense<0.000000e+00> : vector<16x128xf32>
    %4 = tpu.matmul %1, %3, %cst {dimension_numbers = #tpu.dot_dimension_numbers<[1], [0], [0], [1], [0, 0, 1, 1], [], []>} : vector<16x128xbf16>, vector<128x128xbf16>, vector<16x128xf32> -> vector<16x128xf32>
    %5 = arith.negf %4 : vector<16x128xf32>
    %6 = math.exp %5 : vector<16x128xf32>
    %cst_5 = arith.constant 1.000000e+00 : f32
    %7 = vector.broadcast %cst_5 : f32 to vector<16x128xf32>
    %8 = arith.addf %7, %6 : vector<16x128xf32>
    %9 = arith.divf %7, %8 : vector<16x128xf32>
    %10 = arith.mulf %4, %9 : vector<16x128xf32>
    %11 = arith.addf %0, %10 : vector<16x128xf32>
    %12 = arith.truncf %11 : vector<16x128xf32> to vector<16x128xbf16>
    %c0_6 = arith.constant 0 : index
    %c1 = arith.constant 1 : index
    %c0_7 = arith.constant 0 : index
    %c0_8 = arith.constant 0 : index
    %13 = vector.load %arg2[%c0_6, %c1, %c0_7, %c0_8] : memref<1x2x128x128xbf16, #tpu.memory_space<vmem>>, vector<1x1x128x128xbf16>
    %14 = vector.shape_cast %13 : vector<1x1x128x128xbf16> to vector<128x128xbf16>
    %cst_9 = arith.constant dense<0.000000e+00> : vector<16x128xf32>
    %15 = tpu.matmul %12, %14, %cst_9 {dimension_numbers = #tpu.dot_dimension_numbers<[1], [0], [0], [1], [0, 0, 1, 1], [], []>} : vector<16x128xbf16>, vector<128x128xbf16>, vector<16x128xf32> -> vector<16x128xf32>
    %16 = arith.negf %15 : vector<16x128xf32>
    %17 = math.exp %16 : vector<16x128xf32>
    %cst_10 = arith.constant 1.000000e+00 : f32
    %18 = vector.broadcast %cst_10 : f32 to vector<16x128xf32>
    %19 = arith.addf %18, %17 : vector<16x128xf32>
    %20 = arith.divf %18, %19 : vector<16x128xf32>
    %21 = arith.mulf %15, %20 : vector<16x128xf32>
    %22 = arith.addf %11, %21 : vector<16x128xf32>
    %23 = arith.truncf %22 : vector<16x128xf32> to vector<16x128xbf16>
    %c0_11 = arith.constant 0 : index
    %c0_12 = arith.constant 0 : index
    %c0_13 = arith.constant 0 : index
    %24 = vector.load %arg3[%c0_11, %c0_12, %c0_13] : memref<1x16x128xbf16, #tpu.memory_space<vmem>>, vector<1x16x128xbf16>
    %25 = vector.shape_cast %24 : vector<1x16x128xbf16> to vector<16x128xbf16>
    %26 = vector.shape_cast %23 : vector<16x128xbf16> to vector<1x16x128xbf16>
    tpu.vector_store %arg3[%c0_11, %c0_12, %c0_13], %26 {strides = array<i32>} : memref<1x16x128xbf16, #tpu.memory_space<vmem>>, vector<1x16x128xbf16>,
    return
  }
  func.func @transform_0(%arg0: i32) -> (i32, i32) {
    %c0_i32 = arith.constant 0 : i32
    %c0_i32_0 = arith.constant 0 : i32
    %c0_i32_1 = arith.constant 0 : i32
    return %c0_i32, %c0_i32_0 : i32, i32
  }
  func.func @transform_1(%arg0: i32) -> (i32, i32, i32, i32) {
    %c0_i32 = arith.constant 0 : i32
    %c0_i32_0 = arith.constant 0 : i32
    %c0_i32_1 = arith.constant 0 : i32
    %c0_i32_2 = arith.constant 0 : i32
    return %arg0, %c0_i32, %c0_i32_0, %c0_i32_1 : i32, i32, i32, i32
  }
  func.func @transform_2(%arg0: i32) -> (i32, i32, i32) {
    %c0_i32 = arith.constant 0 : i32
    %c0_i32_0 = arith.constant 0 : i32
    %c0_i32_1 = arith.constant 0 : i32
    return %arg0, %c0_i32, %c0_i32_0 : i32, i32, i32
  }
}

</mosaic_0001>

<bundles_post_ra>
// kernel: tpu_custom_call.1
= control target key start
LH: loop header
LB: loop body
LE: loop exit
PB: predicated region body
PF: predicated region fallthrough
CT: control target
= control target key end

     0   :  { %7 = vsyncpa [#allocation3], 0  ;;  %s1119_s0 = inlined_call_operand.hbm [shape: f32[16,128], index: 0, kind: input, shape index: {}]   ;;  %s1120_s1 = inlined_call_operand.hbm [shape: bf16[3,2,128,128], index: 1, kind: input, shape index: {}]   ;;  %s1121_s2 = inlined_call_operand.hbm [shape: bf16[3,16,128], index: 2, kind: output, shape index: {}]  }
   0x1   :  { %8 = vsyncpa [#allocation6], 0 }
   0x2   :  { %10 = vsyncpa [#allocation6 + $0x1], 0 }
   0x3   :  { %11 = vsyncpa [#allocation4], 0 }
   0x4   :  { %13 = vsyncpa [#allocation4 + $0x1], 0  ;;  %s908_s9 = smov 0   ;;  %s910_s10 = smov 0  }
   0x5   :  { %s912_s11 = smov 0   ;;  %s914_s12 = smov 0  }
   0x6 LB: > { %s929_s13 = sadd.s32 4294967295, %s880_s12   ;;  %s534_s14 = sadd.s32 4294967294, %s880_s12   ;;  %s880_s12 = sphi %s914_s12, %s1140_s12   ;;  %s876_s11 = sphi %s912_s11, %s1139_s11   ;;  %s872_s10 = sphi %s910_s10, %s1138_s10   ;;  %s868_s9 = sphi %s908_s9, %s1137_s9  }
   0x7   : > { %p60_p0 = scmp.ne.s32.totalorder %s872_s10, %s868_s9  ;;  %p1122_p1 = scmp.eq.s32.totalorder %s929_s13, 0 }
   0x8   : > { %p90_p3 = scmp.eq.s32.totalorder %s534_s14, 2  ;;  %p535_p5 = scmp.ge.s32.totalorder %s880_s12, 1 }
   0x9   : > { %p938_p4 = por %p1122_p1, %p60_p0  ;;  %p97_p7 = scmp.lt.s32.totalorder %s880_s12, 4 }
   0xa   : > { %p943_p6 = por %p90_p3, %p60_p0  ;;  %s882_s18 = smov [#allocation2]  }
   0xb   : > { %s1125_s15 = scalar_select %p938_p4, 1, 0 }
   0xc   : > { %s1126_s16 = scalar_select %p943_p6, 1, 0 }
   0xd   : > { %p948_p8 = pnand %p535_p5, %p97_p7  ;;  %s109_s19 = sshll.u32 %s882_s18, 4  ;;  %s110_s19 = int_to_ptr.vmem [resolvable:$true] %s109_s19 }
   0xe   : > { %s961_s21 = sadd.s32 1, %s880_s12   ;;  %s47_s22 = sadd.s32 1, %s876_s11 }
   0xf   : > { %s1127_s17 = scalar_select %p948_p8, 1, 0 }
  0x10   : > { %p663_p9 = pneg %p948_p8  ;;  %s44_s23 = ssub.s32 %s880_s12, %s961_s21 }
  0x11   : > { %s752_s26 = scalar_lea.hbm %s1119_s0, 256 }
  0x12   : > { %p956_p10 = pnand %p663_p9, %p1122_p1  ;;  %p753_p11 = scmp.ne.s32.totalorder %s1119_s0, %s752_s26 }
  0x13   : > { %p759_p3 = scmp.lt.u32.totalorder %s752_s26, %s1119_s0 }
  0x14   : > { %p754_p12 = pneg %p956_p10 }
  0x16   : > { %p755_p13 = pnand %p754_p12, %p753_p11 }
  0x18   : > { %p756_p0 = pneg %p755_p13 }
  0x1a   : > { %p761_p5 = pnand %p759_p3, %p756_p0 }
  0x1c   : > { %764 = shalt.err (!%p761_p5)
}
  0x1d   : > { %s765_s3 = scalar_lea.vmem %s110_s19, 256  ;;  %p773_p2 = scmp.lt.s32.totalorder %s110_s19, %s110_s19 }
  0x1e   : > { %p766_p7 = scmp.ne.s32.totalorder %s110_s19, %s765_s3  ;;  %p774_p6 = scmp.lt.s32.totalorder %s765_s3, %s765_s3 }
  0x20   : > { %p768_p9 = pnand %p766_p7, %p754_p12  ;;  %p775_p4 = por %p774_p6, %p773_p2 }
  0x22   : > { %p769_p1 = pneg %p768_p9 }
  0x24   : > { %p776_p8 = pnand %p775_p4, %p769_p1 }
  0x26   : > { %779 = shalt.err (!%p776_p8)
}
  0x27   : > { %s883_s4 = smov 128   ;;  %s884_s5 = smov 8  }
  0x28   : > { %666 = dma.hbm_to_vmem [thread:$0]  (!%p956_p10), %s1119_s0, 256, %s110_s19, [#allocation3], %s883_s4, %s883_s4, %s884_s5  }
  0x29   : > { %p45_p11 = scmp.eq.s32.totalorder %s44_s23, 0  ;;  %p54_p2 = scmp.ne.s32.totalorder %s876_s11, %s872_s10 }
  0x2a   : > { %p55_p1 = scmp.eq.s32.totalorder %s880_s12, 0  ;;  %p676_p4 = scmp.lt.s32.totalorder %s880_s12, 3 }
  0x2b   : > { %s987_s8 = scalar_select %p45_p11, %s876_s11, %s47_s22  }
  0x2c   : > { %p56_p6 = por %p55_p1, %p54_p2  ;;  %p1129_p8 = scmp.eq.s32.totalorder %s929_s13, 2 }
  0x2d   : > { %s123_s18 = sand.u32 1, %s876_s11   ;;  %s588_s24 = sshll.u32 %s880_s12, 11 }
  0x2e   : > { %p991_p12 = por %p1129_p8, %p54_p2  ;;  %s538_s25 = sshll.u32 %s123_s18, 7 }
  0x2f   : > { %s1000_s27 = scalar_lea.hbm %s1120_s1, %s588_s24  ;;  %s127_s19 = scalar_lea.vmem [#allocation5], %s538_s25 }
  0x30   : > { %s134_s22 = sshll.u32 %s127_s19, 4  ;;  %p1002_p10 = pnand %p676_p4, %p56_p6  ;;  %s1006_s22 = int_to_ptr.vmem [resolvable:$true] %s134_s22 }
  0x31   : > { %s1008_s28 = scalar_lea.sflag [#allocation6], %s123_s18  ;;  %s780_s29 = scalar_lea.hbm %s1000_s27, 2048 }
  0x32   : > { %p781_p13 = scmp.ne.s32.totalorder %s1000_s27, %s780_s29  ;;  %p782_p0 = pneg %p1002_p10 }
  0x33   : > { %s785_s4 = scalar_lea.hbm %s1120_s1, 6144  ;;  %p786_p7 = scmp.lt.u32.totalorder %s1000_s27, %s1120_s1 }
  0x34   : > { %p783_p3 = pnand %p782_p0, %p781_p13  ;;  %p787_p9 = scmp.lt.u32.totalorder %s785_s4, %s780_s29 }
  0x35   : > { %p789_p2 = scmp.lt.u32.totalorder %s780_s29, %s1000_s27 }
  0x36   : > { %p784_p5 = pneg %p783_p3  ;;  %p788_p11 = por %p787_p9, %p786_p7 }
  0x38   : > { %p790_p1 = por %p789_p2, %p788_p11 }
  0x3a   : > { %p791_p4 = pnand %p790_p1, %p784_p5 }
  0x3c   : > { %794 = shalt.err (!%p791_p4)
}
  0x3d   : > { %s795_s7 = scalar_lea.vmem %s1006_s22, 2048  ;;  %s885_s18 = smov [#allocation5]  }
  0x3e   : > { %p796_p6 = scmp.ne.s32.totalorder %s1006_s22, %s795_s7  ;;  %s800_s24 = sshll.u32 %s885_s18, 4  ;;  %s801_s24 = int_to_ptr.vmem [resolvable:$false] %s800_s24 }
  0x3f   : > { %s802_s25 = scalar_lea.vmem %s801_s24, 4096  ;;  %p803_p3 = scmp.lt.s32.totalorder %s1006_s22, %s801_s24 }
  0x40   : > { %p798_p8 = pnand %p796_p6, %p782_p0  ;;  %p804_p7 = scmp.lt.s32.totalorder %s802_s25, %s795_s7 }
  0x42   : > { %p799_p13 = pneg %p798_p8  ;;  %p805_p9 = por %p804_p7, %p803_p3 }
  0x44   : > { %p806_p11 = pnand %p805_p9, %p799_p13 }
  0x46   : > { %809 = shalt.err (!%p806_p11)
}
  0x47   : > { %s886_s20 = smov 64   ;;  %s887_s26 = smov 4  }
  0x48   : > { %670 = dma.hbm_to_vmem [thread:$0]  (!%p1002_p10), %s1000_s27, 2048, %s1006_s22, %s1008_s28, %s886_s20, %s886_s20, %s887_s26  }
  0x49   : > { %p1132_p0 = scmp.ne.s32.totalorder %s1127_s17, 0 }
  0x4a   : > { %p1133_p5 = scmp.eq.s32.totalorder (!%p1132_p0), %s929_s13, 0 }
  0x4b   : > { %146 = sbr.rel (%p1132_p0) target bundleno = 628 (0x274), region = 28 }
  0x52   : > { %855 = dma.done.wait (%p1133_p5), [#allocation3], 256   ;;  %p1134_p2 = pmov %p1133_p5 }
  0x53   : > { %s1043_s19 = sand.u32 1, %s872_s10   ;;  %p1135_p10 = scmp.ne.s32.totalorder %s1125_s15, 0 }
  0x54   : > { %857 = vsyncadd (%p1134_p2), [#allocation3], 4294967040  ;;  %s543_s29 = sshll.u32 %s1043_s19, 7  ;;  %s153_s30 = scalar_lea.sflag [#allocation6], %s1043_s19 }
  0x55   : > { %s1047_s3 = scalar_lea.vmem [#allocation5], %s543_s29 }
  0x56   : > { %859 = dma.done.wait (%p1135_p10), %s153_s30, 2048  }
  0x57   : > { %861 = vsyncadd (%p1135_p10), %s153_s30, 4294965248  ;;  %v888_v0 = vmov 0.0   ;;  %vm889_vm0 = vmmov 0   ;;  %v720_v1 = vld [vmem:[%s1047_s3] sm:$0xff]   ;;  %v721_v2 = vld [vmem:[%s1047_s3 + $0x8] sm:$0xff]   ;;  %s544_s15 = sshll.u32 %s1043_s19, 3 }
  0x58   : > { %615 = vmatprep.subr.bf16.mxu0 %v888_v0  ;;  %631 = vmatprep.mubr.msk.bf16.mxu0 %vm889_vm0, %v888_v0  ;;  %v722_v3 = vld [vmem:[%s1047_s3 + $0x10] sm:$0xff]   ;;  %v723_v4 = vld [vmem:[%s1047_s3 + $0x18] sm:$0xff]   ;;  %v724_v5 = vld [vmem:[%s1047_s3 + $0x20] sm:$0xff]   ;;  %s591_s17 = sshll.u32 %s929_s13, 7  ;;  %s176_s27 = scalar_lea.vmem [#allocation7], %s544_s15 }
  0x59   : > { %635 = vmatprep.subr.bf16.mxu1 %v888_v0  ;;  %651 = vmatprep.mubr.msk.bf16.mxu1 %vm889_vm0, %v888_v0  ;;  %v725_v6 = vld [vmem:[%s1047_s3 + $0x28] sm:$0xff]   ;;  %v726_v7 = vld [vmem:[%s1047_s3 + $0x30] sm:$0xff]   ;;  %v727_v8 = vld [vmem:[%s1047_s3 + $0x38] sm:$0xff]   ;;  %s449_s22 = sshll.u32 %s176_s27, 4  ;;  %s1074_s4 = scalar_lea.hbm %s1121_s2, %s591_s17  ;;  %s1076_s22 = int_to_ptr.vmem [resolvable:$true] %s449_s22 }
  0x5a   : > { %616 = vmatpush3.bf16.msra.mxu0 %v720_v1  ;;  %v178_v9 = vld [vmem:[#allocation2] sm:$0xff]  ;;  %v179_v10 = vld [vmem:[#allocation2 + $0x8] sm:$0xff]  ;;  %v728_v12 = vld [vmem:[%s1047_s3 + $0x40] sm:$0xff]   ;;  %s436_s5 = scalar_lea.sflag [#allocation4], %s1043_s19  ;;  %s810_s6 = scalar_lea.vmem %s1076_s22, 128 }
  0x5b   : > { %617 = vmatprep.subr.bf16.mxu0 %v888_v0  ;;  %v180_v11 = vpack.c.bf16 %v179_v10, %v178_v9  ;;  %636 = vmatpush3.bf16.msra.mxu1 %v728_v12  ;;  %v729_v13 = vld [vmem:[%s1047_s3 + $0x48] sm:$0xff]   ;;  %v730_v14 = vld [vmem:[%s1047_s3 + $0x50] sm:$0xff]   ;;  %v731_v15 = vld [vmem:[%s1047_s3 + $0x58] sm:$0xff]   ;;  %p811_p1 = scmp.ne.s32.totalorder %s1076_s22, %s810_s6  ;;  %s890_s13 = smov [#allocation7]  }
  0x5c   : > { %637 = vmatprep.subr.bf16.mxu1 %v888_v0  ;;  %v732_v16 = vld [vmem:[%s1047_s3 + $0x60] sm:$0xff]   ;;  %v733_v17 = vld [vmem:[%s1047_s3 + $0x68] sm:$0xff]   ;;  %v734_v18 = vld [vmem:[%s1047_s3 + $0x70] sm:$0xff]   ;;  %s814_s7 = sshll.u32 %s890_s13, 4  ;;  %s815_s7 = int_to_ptr.vmem [resolvable:$false] %s814_s7 }
  0x5d   : > { %v735_v19 = vld [vmem:[%s1047_s3 + $0x78] sm:$0xff]   ;;  %p812_p4 = pnand %p811_p1, %p991_p12  ;;  %s816_s18 = scalar_lea.vmem %s815_s7, 256 }
  0x5e   : > { %618 = vmatpush3.bf16.msra.mxu0 %v721_v2  ;;  %p817_p8 = scmp.lt.s32.totalorder %s1076_s22, %s815_s7  ;;  %p818_p13 = scmp.lt.s32.totalorder %s816_s18, %s810_s6 }
  0x5f   : > { %619 = vmatprep.subr.bf16.mxu0 %v888_v0  ;;  %638 = vmatpush3.bf16.msra.mxu1 %v729_v13  ;;  %p813_p6 = pneg %p812_p4 }
  0x60   : > { %639 = vmatprep.subr.bf16.mxu1 %v888_v0  ;;  %p819_p3 = por %p818_p13, %p817_p8 }
  0x62   : > { %620 = vmatpush3.bf16.msra.mxu0 %v722_v3  ;;  %p820_p7 = pnand %p819_p3, %p813_p6 }
  0x63   : > { %621 = vmatprep.subr.bf16.mxu0 %v888_v0  ;;  %640 = vmatpush3.bf16.msra.mxu1 %v730_v14 }
  0x64   : > { %641 = vmatprep.subr.bf16.mxu1 %v888_v0 }
  0x66   : > { %622 = vmatpush3.bf16.msra.mxu0 %v723_v4 }
  0x67   : > { %623 = vmatprep.subr.bf16.mxu0 %v888_v0  ;;  %642 = vmatpush3.bf16.msra.mxu1 %v731_v15 }
  0x68   : > { %643 = vmatprep.subr.bf16.mxu1 %v888_v0 }
  0x6a   : > { %624 = vmatpush3.bf16.msra.mxu0 %v724_v5 }
  0x6b   : > { %625 = vmatprep.subr.bf16.mxu0 %v888_v0  ;;  %644 = vmatpush3.bf16.msra.mxu1 %v732_v16 }
  0x6c   : > { %645 = vmatprep.subr.bf16.mxu1 %v888_v0 }
  0x6e   : > { %626 = vmatpush3.bf16.msra.mxu0 %v725_v6 }
  0x6f   : > { %627 = vmatprep.subr.bf16.mxu0 %v888_v0  ;;  %646 = vmatpush3.bf16.msra.mxu1 %v733_v17 }
  0x70   : > { %647 = vmatprep.subr.bf16.mxu1 %v888_v0 }
  0x72   : > { %628 = vmatpush3.bf16.msra.mxu0 %v726_v7 }
  0x73   : > { %629 = vmatprep.subr.bf16.mxu0 %v888_v0  ;;  %648 = vmatpush3.bf16.msra.mxu1 %v734_v18 }
  0x74   : > { %649 = vmatprep.subr.bf16.mxu1 %v888_v0 }
  0x76   : > { %630 = vmatpush3.bf16.msra.mxu0 %v727_v8 }
  0x77   : > { %650 = vmatpush3.bf16.msra.mxu1 %v735_v19 }
  0x79   : > { %632 = vmatmul.mubr.bf16.vlgmr.msra.gmra.mrb[0].mxu0 %v180_v11 }
 0x14c   : > { %v279_v20 = vpop.f32.mrb[0].mxu0 }
 0x14d   : > { %v553_v21 = vmul.f32 -1.442695, %v279_v20  ;;  %v633_v22 = vpop.f32.mrb[1].mxu0 }
 0x14e   : > { %v282_v23 = vpop.f32.mrb[2].mxu0 }
 0x14f   : > { %736 = vpow2.f32 %v553_v21  ;;  %v554_v24 = vmul.f32 -1.442695, %v282_v23  ;;  %v634_v25 = vpop.f32.mrb[3].mxu0 }
 0x151   : > { %738 = vpow2.f32 %v554_v24 }
 0x159   : > { %v737_v26 = vpop.eup %736 }
 0x15a   : > { %v292_v27 = vadd.f32 1.0, %v737_v26 }
 0x15b   : > { %v739_v28 = vpop.eup %738 }
 0x15c   : > { %740 = vrcp.f32 %v292_v27  ;;  %v293_v29 = vadd.f32 1.0, %v739_v28 }
 0x15e   : > { %742 = vrcp.f32 %v293_v29 }
 0x166   : > { %v741_v30 = vpop.eup %740 }
 0x167   : > { %v298_v31 = vmul.f32 %v741_v30, %v279_v20 }
 0x168   : > { %v743_v32 = vpop.eup %742 }
 0x169   : > { %v299_v33 = vmul.f32 %v743_v32, %v282_v23  ;;  %v300_v34 = vadd.f32 %v298_v31, %v178_v9 }
 0x16b   : > { %v301_v35 = vadd.f32 %v299_v33, %v179_v10 }
 0x16d   : > { %v302_v36 = vpack.c.bf16 %v301_v35, %v300_v34 }
 0x16f   : > { %652 = vmatmul.mubr.bf16.vlgmr.msra.gmra.mrb[0].mxu1 %v302_v36 }
 0x242   : > { %v402_v37 = vpop.f32.mrb[0].mxu1 }
 0x243   : > { %v579_v38 = vmul.f32 -1.442695, %v402_v37  ;;  %v653_v39 = vpop.f32.mrb[1].mxu1 }
 0x244   : > { %v405_v40 = vpop.f32.mrb[2].mxu1 }
 0x245   : > { %744 = vpow2.f32 %v579_v38  ;;  %v580_v41 = vmul.f32 -1.442695, %v405_v40  ;;  %v654_v42 = vpop.f32.mrb[3].mxu1 }
 0x247   : > { %746 = vpow2.f32 %v580_v41 }
 0x24f   : > { %v745_v43 = vpop.eup %744 }
 0x250   : > { %v415_v44 = vadd.f32 1.0, %v745_v43 }
 0x251   : > { %v747_v45 = vpop.eup %746 }
 0x252   : > { %748 = vrcp.f32 %v415_v44  ;;  %v416_v46 = vadd.f32 1.0, %v747_v45 }
 0x254   : > { %750 = vrcp.f32 %v416_v46 }
 0x25c   : > { %v749_v47 = vpop.eup %748 }
 0x25d   : > { %v421_v48 = vmul.f32 %v749_v47, %v402_v37 }
 0x25e   : > { %v751_v49 = vpop.eup %750 }
 0x25f   : > { %v422_v50 = vmul.f32 %v751_v49, %v405_v40  ;;  %v423_v51 = vadd.f32 %v421_v48, %v300_v34 }
 0x261   : > { %v424_v52 = vadd.f32 %v422_v50, %v301_v35 }
 0x263   : > { %v595_v53 = vpack.c.bf16 %v424_v52, %v423_v51 }
 0x265   : > { %596 = vst [vmem:[%s176_s27] sm:$0xff] %v595_v53  }
 0x266   : > { %823 = shalt.err (!%p820_p7)
}
 0x267   : > { %s824_s24 = scalar_lea.hbm %s1074_s4, 128  ;;  %s828_s26 = scalar_lea.hbm %s1121_s2, 384 }
 0x268   : > { %p825_p9 = scmp.ne.s32.totalorder %s1074_s4, %s824_s24  ;;  %p829_p5 = scmp.lt.u32.totalorder %s1074_s4, %s1121_s2 }
 0x269   : > { %p830_p2 = scmp.lt.u32.totalorder %s828_s26, %s824_s24  ;;  %p832_p1 = scmp.lt.u32.totalorder %s824_s24, %s1074_s4 }
 0x26a   : > { %p826_p11 = pnand %p825_p9, %p991_p12 }
 0x26b   : > { %p831_p10 = por %p830_p2, %p829_p5 }
 0x26c   : > { %p827_p0 = pneg %p826_p11 }
 0x26d   : > { %p833_p4 = por %p832_p1, %p831_p10 }
 0x26f   : > { %p834_p6 = pnand %p833_p4, %p827_p0 }
 0x271   : > { %837 = shalt.err (!%p834_p6)
}
 0x272   : > { %s891_s3 = smov 64   ;;  %s892_s15 = smov 4  }
 0x273   : > { %661 = dma.vmem_to_hbm [thread:$0]  (%p991_p12), %s1076_s22, 128, %s1074_s4, %s436_s5, %s891_s3, %s891_s3, %s892_s15  }
 0x274 PF: > { %p678_p8 = scmp.ge.s32.totalorder %s880_s12, 2  ;;  %s464_s17 = sand.u32 1, %s868_s9  }
 0x275   : > { %p1136_p13 = scmp.ne.s32.totalorder %s1126_s16, 0  ;;  %s465_s27 = scalar_lea.sflag [#allocation4], %s464_s17 }
 0x277   : > { %p672_p3 = pnand %p678_p8, %p1136_p13 }
 0x279   : > { %863 = dma.done.wait (!%p672_p3), %s465_s27, 128  }
 0x27a   : > { %865 = vsyncadd (!%p672_p3), %s465_s27, 4294967168  ;;  %p16_p7 = scmp.ge.s32.totalorder %s961_s21, 5   ;;  %s1137_s9 = smov %s872_s10 }
 0x27b   : > { %s1138_s10 = smov %s876_s11  ;;  %s1139_s11 = smov %s987_s8 }
 0x27c   : > { %s1140_s12 = smov %s961_s21  ;;  %18 = sbr.rel (!%p16_p7) target bundleno = 6 (0x6), region = 79 }
 0x283   :  { %470 = vsyncpa [#allocation3], 1 }
 0x284   :  { %472 = vsyncpa [#allocation3 + $0x1], 1 }
 0x285   :  { %473 = vsyncpa [#allocation6], 1 }
 0x286   :  { %475 = vsyncpa [#allocation6 + $0x1], 1 }
 0x287   :  { %476 = vsyncpa [#allocation4], 1 }
 0x288   :  { %478 = vsyncpa [#allocation4 + $0x1], 1 }

</bundles_post_ra>
